<compile_context>
chip_gen: v7x
topology: tpu7x:2x2x1
jax: 0.10.0
libtpu: 0.0.40
codegen_flags: <defaults>
</compile_context>

<pallas_src>
import functools

import jax
import jax.numpy as jnp
from jax.experimental import pallas as pl
from jax.experimental.pallas import tpu as pltpu


def _round_up(x, m):
    return (x + m - 1) // m * m


def _complex_conv_kernel(r_ref, i_ref, wr_ref, wi_ref, b_ref, ro_ref, io_ref,
                         *, cout, cpad, nb):
    # r_ref/i_ref : (nb, Cin, TL)      bf16 (compute dtype)
    # wr_ref/wi_ref: (2*cpad, Cin)     bf16   rows [0:cout]=real half, [cpad:cpad+cout]=imag half
    # b_ref       : (2*cpad, 1)        f32
    # ro_ref/io_ref: (nb, Cout, TL)    store dtype
    wr = wr_ref[...]          # hoisted: loaded once per grid step, reused over nb
    wi = wi_ref[...]
    bias = b_ref[...]
    for b in range(nb):       # nb is small & static -> unrolled at trace time
        acc = jnp.dot(wr, r_ref[b], preferred_element_type=jnp.float32)
        acc = acc + jnp.dot(wi, i_ref[b], preferred_element_type=jnp.float32)
        acc = acc + bias                                  # lane broadcast
        ro_ref[b] = acc[:cout].astype(ro_ref.dtype)       # sublane-aligned split
        io_ref[b] = acc[cpad:cpad + cout].astype(io_ref.dtype)


@functools.partial(jax.jit,
                   static_argnames=("target_block_bytes", "compute_dtype",
                                    "store_dtype"))
def complex_conv2d(x, wr, br, wi, bi, *, target_block_bytes=1 << 20,
                   compute_dtype=jnp.bfloat16, store_dtype=jnp.float32):
    """x: complex64 (N, Cin, H, W); wr/wi: (Cout, Cin, 1, 1); br/bi: (Cout,)."""
    N, Cin, H, W = x.shape
    Cout = wr.shape[0]
    HW = H * W
    Cpad = _round_up(Cout, 8)     # align the imag half of the acc to a sublane tile

    # ---- prologue: planar real/imag in compute dtype (one fused XLA pass). ----
    # NCHW kept; spatial flattened onto the minor (lane) dim -> no transposes.
    real3d = jnp.real(x).reshape(N, Cin, HW).astype(compute_dtype)
    imag3d = jnp.imag(x).reshape(N, Cin, HW).astype(compute_dtype)

    # ---- block-complex weights / bias:
    #   acc = [Wr; Wi] @ r + [-Wi; Wr] @ i + [br-bi; br+bi]
    #   rows [0:Cout]          -> real_out
    #   rows [Cpad:Cpad+Cout]  -> imag_out
    wr2d = wr.reshape(Cout, Cin)
    wi2d = wi.reshape(Cout, Cin)
    rpad = ((0, Cpad - Cout), (0, 0))
    wr_blk = jnp.concatenate([jnp.pad(wr2d, rpad), jnp.pad(wi2d, rpad)],
                             axis=0).astype(compute_dtype)            # (2*Cpad, Cin)
    wi_blk = jnp.concatenate([jnp.pad(-wi2d, rpad), jnp.pad(wr2d, rpad)],
                             axis=0).astype(compute_dtype)            # (2*Cpad, Cin)
    b_blk = jnp.concatenate([jnp.pad(br - bi, (0, Cpad - Cout)),
                             jnp.pad(br + bi, (0, Cpad - Cout))]
                            ).reshape(2 * Cpad, 1).astype(jnp.float32)

    # ---- step sizing: ~target_block_bytes of HBM traffic per grid step. ----
    in_bpe = jnp.dtype(compute_dtype).itemsize
    out_bpe = jnp.dtype(store_dtype).itemsize
    per_col = 2 * Cin * in_bpe + 2 * Cout * out_bpe   # bytes per (batch, pixel) column
    cols = max(128, target_block_bytes // per_col)    # target pixel columns per step
    if HW > cols:
        nb = 1
        tl = _round_up(cols, 128)    # lane-dense tile; ragged last block is masked
    else:
        tl = HW                      # full spatial row per block (== array dim, any size ok)
        nb = max(1, min(N, cols // max(HW, 1)))
        if N > 1:                    # keep >= 2 grid steps: v7x 2-TC sharding + pipelining
            nb = min(nb, (N + 1) // 2)
    grid = (pl.cdiv(N, nb), pl.cdiv(HW, tl))

    act_spec = pl.BlockSpec((nb, Cin, tl), lambda n, m: (n, 0, m))
    w_spec = pl.BlockSpec((2 * Cpad, Cin), lambda n, m: (0, 0))
    b_spec = pl.BlockSpec((2 * Cpad, 1), lambda n, m: (0, 0))
    out_spec = pl.BlockSpec((nb, Cout, tl), lambda n, m: (n, 0, m))

    # Double-buffered working set ~2 * block_bytes; stays under v5e's 16 MiB
    # default scoped VMEM with the 1 MiB default.  Raise the limit only if the
    # caller asks for bigger blocks (cap at 32 MiB = v7x default scoped VMEM).
    block_bytes = nb * tl * per_col
    compiler_kwargs = dict(dimension_semantics=("parallel", "parallel"))
    if 2 * block_bytes > 12 * 1024 * 1024:
        compiler_kwargs["vmem_limit_bytes"] = 32 * 1024 * 1024

    kernel = functools.partial(_complex_conv_kernel, cout=Cout, cpad=Cpad, nb=nb)
    real_out, imag_out = pl.pallas_call(
        kernel,
        out_shape=(jax.ShapeDtypeStruct((N, Cout, HW), store_dtype),
                   jax.ShapeDtypeStruct((N, Cout, HW), store_dtype)),
        grid=grid,
        in_specs=[act_spec, act_spec, w_spec, w_spec, b_spec],
        out_specs=(out_spec, out_spec),
        compiler_params=pltpu.CompilerParams(**compiler_kwargs),
    )(real3d, imag3d, wr_blk, wi_blk, b_blk)

    # ---- epilogue: pack to complex64 (one fused pass; see header TODO). ----
    real_out = real_out.astype(jnp.float32).reshape(N, Cout, H, W)
    imag_out = imag_out.astype(jnp.float32).reshape(N, Cout, H, W)
    return jax.lax.complex(real_out, imag_out)


def _init_conv_params(key, out_channels, in_channels):
    # Deterministic init mimicking nn.Conv2d default (kaiming-uniform-ish).
    kw, kb = jax.random.split(key)
    fan_in = in_channels  # kernel_size = 1
    bound = 1.0 / (fan_in ** 0.5)
    w = jax.random.uniform(kw, (out_channels, in_channels, 1, 1),
                           minval=-bound, maxval=bound, dtype=jnp.float32)
    b = jax.random.uniform(kb, (out_channels,),
                           minval=-bound, maxval=bound, dtype=jnp.float32)
    return w, b


if __name__ == "__main__":
    key = jax.random.PRNGKey(0)
    k_x_r, k_x_i, k_r, k_i = jax.random.split(key, 4)

    N, Cin, H, W = 2, 4, 16, 16
    Cout = 8

    x_real = jax.random.normal(k_x_r, (N, Cin, H, W), dtype=jnp.float32)
    x_imag = jax.random.normal(k_x_i, (N, Cin, H, W), dtype=jnp.float32)
    x = jax.lax.complex(x_real, x_imag)

    wr, br = _init_conv_params(k_r, Cout, Cin)
    wi, bi = _init_conv_params(k_i, Cout, Cin)

    out = complex_conv2d(x, wr, br, wi, bi)
    out = jax.block_until_ready(out)

    # Pure-JAX reference.  Match the kernel's bf16 rounding of inputs/weights
    # (accumulation stays f32) so the tolerance can be tight.
    def conv1x1(v, w, b):
        v16 = v.astype(jnp.bfloat16).astype(jnp.float32)
        w16 = w.reshape(Cout, Cin).astype(jnp.bfloat16).astype(jnp.float32)
        return jnp.einsum("nchw,oc->nohw", v16, w16) + b[None, :, None, None]

    ref_real = conv1x1(x_real, wr, br) - conv1x1(x_imag, wi, bi)
    ref_imag = conv1x1(x_imag, wr, br) + conv1x1(x_real, wi, bi)

    assert out.shape == (N, Cout, H, W) and out.dtype == jnp.complex64
    assert jnp.allclose(jnp.real(out), ref_real, atol=1e-3, rtol=1e-3)
    assert jnp.allclose(jnp.imag(out), ref_imag, atol=1e-3, rtol=1e-3)

    print("KERNEL_OK")
</pallas_src>

<mosaic_0001>
module attributes {stable_mosaic.version = 11 : i64} {
  func.func @_complex_conv_kernel(%arg0: i32, %arg1: i32, %arg2: memref<1x4x256xbf16, #tpu.memory_space<vmem>>, %arg3: memref<1x4x256xbf16, #tpu.memory_space<vmem>>, %arg4: memref<16x4xbf16, #tpu.memory_space<vmem>>, %arg5: memref<16x4xbf16, #tpu.memory_space<vmem>>, %arg6: memref<16x1xf32, #tpu.memory_space<vmem>>, %arg7: memref<1x8x256xf32, #tpu.memory_space<vmem>>, %arg8: memref<1x8x256xf32, #tpu.memory_space<vmem>>) attributes {dimension_semantics = [#tpu.dimension_semantics<parallel>, #tpu.dimension_semantics<parallel>], iteration_bounds = array<i64: 2, 1>, scalar_prefetch = 0 : i64, scratch_operands = 0 : i64, tpu.core_type = #tpu.core_type<tc>, window_params = [{transform_indices = @transform_0, window_bounds = array<i64: 1, 4, 256>}, {transform_indices = @transform_1, window_bounds = array<i64: 1, 4, 256>}, {pipeline_mode = #tpu.pipeline_mode<synchronous>, transform_indices = @transform_2, window_bounds = array<i64: 16, 4>}, {pipeline_mode = #tpu.pipeline_mode<synchronous>, transform_indices = @transform_3, window_bounds = array<i64: 16, 4>}, {pipeline_mode = #tpu.pipeline_mode<synchronous>, transform_indices = @transform_4, window_bounds = array<i64: 16, 1>}, {transform_indices = @transform_5, window_bounds = array<i64: 1, 8, 256>}, {transform_indices = @transform_6, window_bounds = array<i64: 1, 8, 256>}]} {
    %c0 = arith.constant 0 : index
    %c0_0 = arith.constant 0 : index
    %0 = vector.load %arg4[%c0, %c0_0] : memref<16x4xbf16, #tpu.memory_space<vmem>>, vector<16x4xbf16>
    %c0_1 = arith.constant 0 : index
    %c0_2 = arith.constant 0 : index
    %1 = vector.load %arg5[%c0_1, %c0_2] : memref<16x4xbf16, #tpu.memory_space<vmem>>, vector<16x4xbf16>
    %c0_3 = arith.constant 0 : index
    %c0_4 = arith.constant 0 : index
    %2 = vector.load %arg6[%c0_3, %c0_4] : memref<16x1xf32, #tpu.memory_space<vmem>>, vector<16x1xf32>
    %c0_5 = arith.constant 0 : index
    %c0_6 = arith.constant 0 : index
    %c0_7 = arith.constant 0 : index
    %3 = vector.load %arg2[%c0_5, %c0_6, %c0_7] : memref<1x4x256xbf16, #tpu.memory_space<vmem>>, vector<1x4x256xbf16>
    %4 = vector.shape_cast %3 : vector<1x4x256xbf16> to vector<4x256xbf16>
    %cst = arith.constant dense<0.000000e+00> : vector<16x256xf32>
    %5 = tpu.matmul %0, %4, %cst {dimension_numbers = #tpu.dot_dimension_numbers<[1], [0], [0], [1], [0, 0, 1, 1], [], []>} : vector<16x4xbf16>, vector<4x256xbf16>, vector<16x256xf32> -> vector<16x256xf32>
    %c0_8 = arith.constant 0 : index
    %c0_9 = arith.constant 0 : index
    %c0_10 = arith.constant 0 : index
    %6 = vector.load %arg3[%c0_8, %c0_9, %c0_10] : memref<1x4x256xbf16, #tpu.memory_space<vmem>>, vector<1x4x256xbf16>
    %7 = vector.shape_cast %6 : vector<1x4x256xbf16> to vector<4x256xbf16>
    %cst_11 = arith.constant dense<0.000000e+00> : vector<16x256xf32>
    %8 = tpu.matmul %1, %7, %cst_11 {dimension_numbers = #tpu.dot_dimension_numbers<[1], [0], [0], [1], [0, 0, 1, 1], [], []>} : vector<16x4xbf16>, vector<4x256xbf16>, vector<16x256xf32> -> vector<16x256xf32>
    %9 = arith.addf %5, %8 : vector<16x256xf32>
    %10 = vector.broadcast %2 : vector<16x1xf32> to vector<16x256xf32>
    %11 = arith.addf %9, %10 : vector<16x256xf32>
    %12 = vector.extract_strided_slice %11 {offsets = [0, 0], sizes = [8, 256], strides = [1, 1]} : vector<16x256xf32> to vector<8x256xf32>
    %c0_12 = arith.constant 0 : index
    %c0_13 = arith.constant 0 : index
    %c0_14 = arith.constant 0 : index
    %13 = vector.load %arg7[%c0_12, %c0_13, %c0_14] : memref<1x8x256xf32, #tpu.memory_space<vmem>>, vector<1x8x256xf32>
    %14 = vector.shape_cast %13 : vector<1x8x256xf32> to vector<8x256xf32>
    %15 = vector.shape_cast %12 : vector<8x256xf32> to vector<1x8x256xf32>
    tpu.vector_store %arg7[%c0_12, %c0_13, %c0_14], %15 {strides = array<i32>} : memref<1x8x256xf32, #tpu.memory_space<vmem>>, vector<1x8x256xf32>,
    %16 = vector.extract_strided_slice %11 {offsets = [8, 0], sizes = [8, 256], strides = [1, 1]} : vector<16x256xf32> to vector<8x256xf32>
    %c0_15 = arith.constant 0 : index
    %c0_16 = arith.constant 0 : index
    %c0_17 = arith.constant 0 : index
    %17 = vector.load %arg8[%c0_15, %c0_16, %c0_17] : memref<1x8x256xf32, #tpu.memory_space<vmem>>, vector<1x8x256xf32>
    %18 = vector.shape_cast %17 : vector<1x8x256xf32> to vector<8x256xf32>
    %19 = vector.shape_cast %16 : vector<8x256xf32> to vector<1x8x256xf32>
    tpu.vector_store %arg8[%c0_15, %c0_16, %c0_17], %19 {strides = array<i32>} : memref<1x8x256xf32, #tpu.memory_space<vmem>>, vector<1x8x256xf32>,
    return
  }
  func.func @transform_0(%arg0: i32, %arg1: i32) -> (i32, i32, i32) {
    %c0_i32 = arith.constant 0 : i32
    %c0_i32_0 = arith.constant 0 : i32
    return %arg0, %c0_i32, %arg1 : i32, i32, i32
  }
  func.func @transform_1(%arg0: i32, %arg1: i32) -> (i32, i32, i32) {
    %c0_i32 = arith.constant 0 : i32
    %c0_i32_0 = arith.constant 0 : i32
    return %arg0, %c0_i32, %arg1 : i32, i32, i32
  }
  func.func @transform_2(%arg0: i32, %arg1: i32) -> (i32, i32) {
    %c0_i32 = arith.constant 0 : i32
    %c0_i32_0 = arith.constant 0 : i32
    %c0_i32_1 = arith.constant 0 : i32
    return %c0_i32, %c0_i32_0 : i32, i32
  }
  func.func @transform_3(%arg0: i32, %arg1: i32) -> (i32, i32) {
    %c0_i32 = arith.constant 0 : i32
    %c0_i32_0 = arith.constant 0 : i32
    %c0_i32_1 = arith.constant 0 : i32
    return %c0_i32, %c0_i32_0 : i32, i32
  }
  func.func @transform_4(%arg0: i32, %arg1: i32) -> (i32, i32) {
    %c0_i32 = arith.constant 0 : i32
    %c0_i32_0 = arith.constant 0 : i32
    %c0_i32_1 = arith.constant 0 : i32
    return %c0_i32, %c0_i32_0 : i32, i32
  }
  func.func @transform_5(%arg0: i32, %arg1: i32) -> (i32, i32, i32) {
    %c0_i32 = arith.constant 0 : i32
    %c0_i32_0 = arith.constant 0 : i32
    return %arg0, %c0_i32, %arg1 : i32, i32, i32
  }
  func.func @transform_6(%arg0: i32, %arg1: i32) -> (i32, i32, i32) {
    %c0_i32 = arith.constant 0 : i32
    %c0_i32_0 = arith.constant 0 : i32
    return %arg0, %c0_i32, %arg1 : i32, i32, i32
  }
}

</mosaic_0001>

<bundles_post_ra>
// kernel: custom-call.1
= control target key start
LH: loop header
LB: loop body
LE: loop exit
PB: predicated region body
PF: predicated region fallthrough
CT: control target
= control target key end

     0   :  { %s59_s0 = inlined_call_operand.hbm [shape: c64[2,4,16,16], index: 0, kind: input, shape index: {}]   ;;  %s60_s1 = inlined_call_operand.vmem [shape: f32[2,4,16,16], index: 1, kind: output, shape index: {}]  }
   0x1   :  { %s2_s8 = scalar_lea.hbm %s59_s0, 2048 }
   0x2   :  { %3 = vsyncpa [#allocation0], 0  ;;  %s4_s11 = sshll.u32 %s60_s1, 4  ;;  %s34_s14 = scalar_lea.hbm %s59_s0, 4096  ;;  %s5_s11 = int_to_ptr.vmem [resolvable:$true] %s4_s11 }
   0x3   :  { %p11_p0 = scmp.ne.s32.totalorder %s2_s8, %s34_s14  ;;  %p13_p1 = scmp.lt.u32.totalorder %s2_s8, %s59_s0 }
   0x4   :  { %p14_p2 = scmp.lt.u32.totalorder %s34_s14, %s34_s14  ;;  %p16_p4 = scmp.lt.u32.totalorder %s34_s14, %s2_s8 }
   0x6   :  { %p15_p3 = por %p14_p2, %p13_p1 }
   0x8   :  { %p17_p5 = por %p16_p4, %p15_p3 }
   0xa   :  { %p18_p6 = pnand %p17_p5, %p11_p0 }
   0xc   :  { %21 = shalt.err (!%p18_p6)  }
   0xd   :  { %s22_s17 = scalar_lea.vmem %s5_s11, 2048  ;;  %p27_p8 = scmp.lt.s32.totalorder %s5_s11, %s5_s11 }
   0xe   :  { %p23_p7 = scmp.ne.s32.totalorder %s5_s11, %s22_s17  ;;  %p28_p9 = scmp.lt.s32.totalorder %s22_s17, %s22_s17 }
  0x10   :  { %p29_p10 = por %p28_p9, %p27_p8 }
  0x12   :  { %p30_p11 = pnand %p29_p10, %p23_p7 }
  0x14   :  { %33 = shalt.err (!%p30_p11)  }
  0x15   :  { %7 = dma.hbm_to_vmem [thread:$0]  %s2_s8, 2048, %s5_s11, [#allocation0] }
  0x16   :  { %35 = dma.done.wait [#allocation0], 2048  }
  0x17   :  { %36 = vsyncadd [#allocation0], 4294965248 }
  0x18   :  { %9 = vsyncpa [#allocation0], 1 }

// kernel: custom-call
= control target key start
LH: loop header
LB: loop body
LE: loop exit
PB: predicated region body
PF: predicated region fallthrough
CT: control target
= control target key end

     0   :  { %2 = vsyncpa [#allocation0], 0  ;;  %s61_s0 = inlined_call_operand.hbm [shape: c64[2,4,16,16], index: 0, kind: input, shape index: {}]   ;;  %s62_s1 = inlined_call_operand.vmem [shape: f32[2,4,16,16], index: 1, kind: output, shape index: {}]  }
   0x1   :  { %s3_s8 = sshll.u32 %s62_s1, 4  ;;  %s9_s11 = scalar_lea.hbm %s61_s0, 2048  ;;  %s4_s8 = int_to_ptr.vmem [resolvable:$true] %s3_s8 }
   0x2   :  { %p10_p0 = scmp.ne.s32.totalorder %s61_s0, %s9_s11  ;;  %s11_s16 = scalar_lea.hbm %s61_s0, 4096 }
   0x3   :  { %p12_p1 = scmp.lt.u32.totalorder %s11_s16, %s9_s11  ;;  %p13_p2 = scmp.lt.u32.totalorder %s9_s11, %s61_s0 }
   0x5   :  { %p14_p3 = por %p13_p2, %p12_p1 }
   0x7   :  { %p15_p4 = pnand %p14_p3, %p10_p0 }
   0x9   :  { %18 = shalt.err (!%p15_p4)  }
   0xa   :  { %s19_s1 = scalar_lea.vmem %s4_s8, 2048  ;;  %p24_p6 = scmp.lt.s32.totalorder %s4_s8, %s4_s8 }
   0xb   :  { %p20_p5 = scmp.ne.s32.totalorder %s4_s8, %s19_s1  ;;  %p25_p7 = scmp.lt.s32.totalorder %s19_s1, %s19_s1 }
   0xd   :  { %p26_p8 = por %p25_p7, %p24_p6 }
   0xf   :  { %p27_p9 = pnand %p26_p8, %p20_p5 }
  0x11   :  { %30 = shalt.err (!%p27_p9)  }
  0x12   :  { %6 = dma.hbm_to_vmem [thread:$0]  %s61_s0, 2048, %s4_s8, [#allocation0] }
  0x13   :  { %31 = dma.done.wait [#allocation0], 2048  }
  0x14   :  { %32 = vsyncadd [#allocation0], 4294965248 }
  0x15   :  { %8 = vsyncpa [#allocation0], 1 }

// kernel: custom-call.2
= control target key start
LH: loop header
LB: loop body
LE: loop exit
PB: predicated region body
PF: predicated region fallthrough
CT: control target
= control target key end

     0   :  { %s126_s0 = inlined_call_operand.vmem [shape: f32[2,8,16,16], index: 0, kind: input, shape index: {}]   ;;  %s127_s1 = inlined_call_operand.vmem [shape: f32[2,8,16,16], index: 1, kind: input, shape index: {}]   ;;  %s128_s2 = inlined_call_operand.hbm [shape: c64[2,8,16,16], index: 2, kind: output, shape index: {}]  }
   0x1   :  { %s87_s11 = scalar_lea.hbm %s128_s2, 4096 }
   0x2   :  { %4 = vsyncpa [#allocation0], 0  ;;  %s5_s14 = sshll.u32 %s126_s0, 4  ;;  %s6_s14 = int_to_ptr.vmem [resolvable:$true] %s5_s14 }
   0x3   :  { %s18_s15 = scalar_lea.vmem %s6_s14, 4096  ;;  %p23_p1 = scmp.lt.s32.totalorder %s6_s14, %s6_s14 }
   0x4   :  { %p19_p0 = scmp.ne.s32.totalorder %s6_s14, %s18_s15  ;;  %p24_p2 = scmp.lt.s32.totalorder %s18_s15, %s18_s15 }
   0x6   :  { %p25_p3 = por %p24_p2, %p23_p1 }
   0x8   :  { %p26_p4 = pnand %p25_p3, %p19_p0 }
   0xa   :  { %29 = shalt.err (!%p26_p4)  }
   0xb   :  { %p31_p5 = scmp.ne.s32.totalorder %s128_s2, %s87_s11  ;;  %s32_s0 = scalar_lea.hbm %s128_s2, 8192 }
   0xc   :  { %p33_p6 = scmp.lt.u32.totalorder %s32_s0, %s87_s11  ;;  %p34_p7 = scmp.lt.u32.totalorder %s87_s11, %s128_s2 }
   0xe   :  { %p35_p8 = por %p34_p7, %p33_p6 }
  0x10   :  { %p36_p9 = pnand %p35_p8, %p31_p5 }
  0x12   :  { %39 = shalt.err (!%p36_p9)  }
  0x13   :  { %8 = dma.vmem_to_hbm [thread:$0]  %s6_s14, 4096, %s128_s2, [#allocation0] }
  0x14   :  { %65 = dma.done.wait [#allocation0], 4096  }
  0x15   :  { %66 = vsyncadd [#allocation0], 4294963200 }
  0x16   :  { %10 = vsyncpa [#allocation0], 1 }
  0x17   :  { %11 = vsyncpa [#allocation1], 0  ;;  %s12_s28 = sshll.u32 %s127_s1, 4  ;;  %s13_s28 = int_to_ptr.vmem [resolvable:$true] %s12_s28 }
  0x18   :  { %s40_s29 = scalar_lea.vmem %s13_s28, 4096  ;;  %p45_p11 = scmp.lt.s32.totalorder %s13_s28, %s13_s28 }
  0x19   :  { %p41_p10 = scmp.ne.s32.totalorder %s13_s28, %s40_s29  ;;  %p46_p12 = scmp.lt.s32.totalorder %s40_s29, %s40_s29 }
  0x1b   :  { %p47_p13 = por %p46_p12, %p45_p11 }
  0x1d   :  { %p48_p0 = pnand %p47_p13, %p41_p10 }
  0x1f   :  { %51 = shalt.err (!%p48_p0)  }
  0x20   :  { %p53_p1 = scmp.ne.s32.totalorder %s87_s11, %s32_s0  ;;  %p56_p2 = scmp.lt.u32.totalorder %s32_s0, %s32_s0 }
  0x22   :  { %p57_p3 = por %p56_p2, %p34_p7 }
  0x24   :  { %p59_p4 = por %p57_p3, %p33_p6 }
  0x26   :  { %p60_p5 = pnand %p59_p4, %p53_p1 }
  0x28   :  { %63 = shalt.err (!%p60_p5)  }
  0x29   :  { %15 = dma.vmem_to_hbm [thread:$0]  %s13_s28, 4096, %s87_s11, [#allocation1] }
  0x2a   :  { %67 = dma.done.wait [#allocation1], 4096  }
  0x2b   :  { %68 = vsyncadd [#allocation1], 4294963200 }
  0x2c   :  { %17 = vsyncpa [#allocation1], 1 }

// kernel: complex_conv2d.1
= control target key start
LH: loop header
LB: loop body
LE: loop exit
PB: predicated region body
PF: predicated region fallthrough
CT: control target
= control target key end

     0   :  { %s786_s21 = smov 0   ;;  %s788_s22 = smov 0   ;;  %s841_s0 = inlined_call_operand.vmem [shape: bf16[2,4,256], index: 0, kind: input, shape index: {}]   ;;  %s842_s1 = inlined_call_operand.vmem [shape: bf16[2,4,256], index: 1, kind: input, shape index: {}]   ;;  %s843_s2 = inlined_call_operand.vmem [shape: bf16[16,4], index: 2, kind: input, shape index: {}]   ;;  %s844_s3 = inlined_call_operand.vmem [shape: bf16[16,4], index: 3, kind: input, shape index: {}]   ;;  %s845_s4 = inlined_call_operand.vmem [shape: f32[16,1], index: 4, kind: input, shape index: {}]   ;;  %s846_s5 = inlined_call_operand.vmem [shape: f32[2,8,256], index: 5, kind: output, shape index: {0}]   ;;  %s847_s6 = inlined_call_operand.vmem [shape: f32[2,8,256], index: 6, kind: output, shape index: {1}]  }
   0x1   :  { %s790_s23 = smov 0  }
   0x2 LB: > { %s29_s24 = sadd.s32 1, %s744_s22  ;;  %p671_p0 = scmp.ge.s32.totalorder %s748_s23, 1  ;;  %s748_s23 = sphi %s790_s23, %s17_s23   ;;  %s744_s22 = sphi %s788_s22, %s849_s22   ;;  %s740_s21 = sphi %s786_s21, %s848_s21  }
   0x3   : > { %p31_p1 = scmp.ge.s32.totalorder %s29_s24, 2  ;;  %p255_p2 = scmp.lt.s32.totalorder %s748_s23, 3 }
   0x5   : > { %s851_s24 = smov (%p31_p1, %s29_s24), 0  ;;  %p256_p3 = pnand %p671_p0, %p255_p2 }
   0x6   : > { %p312_p4 = scmp.lt.s32.totalorder (!%p256_p3), %s740_s21, 1  ;;  %v750_v0 = vmov (!%p256_p3), 0   ;;  %v356_v1 = vld [vmem:[%s845_s4] sm:$0xff] (!%p256_p3)  ;;  %vm378_vm0 = vcmask (!%p256_p3), 1041408   ;;  %v357_v2 = vld [vmem:[%s845_s4 + $0x8] sm:$0xff] (!%p256_p3)  ;;  %vm374_vm1 = vcmask (!%p256_p3), 31744  }
   0x7   : > { %259 = sbr.rel (%p256_p3) target bundleno = 245 (0xf5), region = 40  ;;  %417 = vmatprep.mubr.bf16.mxu1 (!%p256_p3), %v750_v0  ;;  %483 = vmatprep.mubr.bf16.mxu0 (!%p256_p3), %v750_v0  ;;  %v724_v9 = vld [vmem:[%s844_s3] sm:$0xff] (!%p256_p3)  }
   0x8   : > { %723 = vset.pattern.permute.xlu0 (!%p256_p3), %v750_v0  ;;  %v725_v10 = vld [vmem:[%s843_s2] sm:$0xff] (!%p256_p3)  }
   0x9   : > { %496 = vperm.xlu0 (!%p256_p3), %723, %v356_v1  }
   0xd   : > { %501 = vperm.xlu0 (!%p256_p3), %723, %v357_v2  }
   0xe   : > { %s853_s21 = smov (!%p312_p4, %s740_s21), 1 }
   0xf   : > { %s690_s27 = sshll.u32 %s853_s21, 2  ;;  %s692_s16 = sshll.u32 %s853_s21, 4 }
  0x10   : > { %s329_s8 = scalar_lea.vmem %s842_s1, %s690_s27  ;;  %s319_s11 = scalar_lea.vmem %s841_s0, %s690_s27 }
  0x11   : > { %v681_v3 = vld.sshfl [vmem:[%s329_s8] sm:$0x33 pattern:$0x76325410]  ;;  %s339_s19 = scalar_lea.vmem %s846_s5, %s692_s16  ;;  %s349_s21 = scalar_lea.vmem %s847_s6, %s692_s16 }
  0x12   : > { %v373_v4 = vcombine.high %v681_v3, %v681_v3  ;;  %v685_v5 = vld.sshfl [vmem:[%s319_s11] sm:$0x33 pattern:$0x76325410]  ;;  %v380_v6 = vsel %vm378_vm0, %v681_v3, 0 }
  0x13   : > { %v441_v7 = vcombine.high %v685_v5, %v685_v5  ;;  %v446_v8 = vsel %vm378_vm0, %v685_v5, 0 }
  0x14   : > { %682 = vmatprep.subr.msk.bf16.mxu1 %vm378_vm0, %v373_v4 }
  0x15   : > { %686 = vmatprep.subr.msk.bf16.mxu0 %vm378_vm0, %v441_v7  ;;  %386 = vmatpush1.bf16.msra.mxu1 %v380_v6 }
  0x16   : > { %452 = vmatpush1.bf16.msra.mxu0 %v446_v8 }
  0x18   : > { %683 = vmatmul.mubr.msk.bf16.vlgmr.msra.gmra.mrb[0].mxu1 %vm374_vm1, %v724_v9 }
  0x19   : > { %687 = vmatmul.mubr.msk.bf16.vlgmr.msra.gmra.mrb[0].mxu0 %vm374_vm1, %v725_v10 }
  0x88   : > { %v497_v11 = vpop.permute.xlu0 %496 }
  0x8c   : > { %v502_v24 = vpop.permute.xlu0 %501 }
  0xeb   : > { %v419_v12 = vpop.f32.mrb[0].mxu1 }
  0xec   : > { %v485_v13 = vpop.f32.mrb[0].mxu0  ;;  %v421_v14 = vpop.f32.mrb[1].mxu1 }
  0xed   : > { %v486_v15 = vadd.f32 %v485_v13, %v419_v12  ;;  %v487_v16 = vpop.f32.mrb[1].mxu0  ;;  %v423_v17 = vpop.f32.mrb[2].mxu1 }
  0xee   : > { %v488_v18 = vadd.f32 %v487_v16, %v421_v14  ;;  %v489_v19 = vpop.f32.mrb[2].mxu0  ;;  %v425_v20 = vpop.f32.mrb[3].mxu1 }
  0xef   : > { %v504_v21 = vadd.f32 %v497_v11, %v486_v15  ;;  %v490_v22 = vadd.f32 %v489_v19, %v423_v17  ;;  %v491_v23 = vpop.f32.mrb[3].mxu0 }
  0xf0   : > { %v505_v25 = vadd.f32 %v497_v11, %v488_v18  ;;  %v492_v26 = vadd.f32 %v491_v23, %v425_v20 }
  0xf1   : > { %508 = vst [vmem:[%s339_s19] sm:$0xff] %v504_v21  ;;  %v506_v27 = vadd.f32 %v502_v24, %v490_v22 }
  0xf2   : > { %509 = vst [vmem:[%s339_s19 + $0x8] sm:$0xff] %v505_v25  ;;  %v507_v28 = vadd.f32 %v502_v24, %v492_v26 }
  0xf3   : > { %510 = vst [vmem:[%s349_s21] sm:$0xff] %v506_v27 }
  0xf4   : > { %511 = vst [vmem:[%s349_s21 + $0x8] sm:$0xff] %v507_v28 }
  0xf5 PF: > { %s17_s23 = sadd.s32 1, %s748_s23   ;;  %s848_s21 = smov %s744_s22 }
  0xf6   : > { %p14_p5 = scmp.ge.s32.totalorder %s17_s23, 4   ;;  %s849_s22 = smov %s851_s24 }
  0xf8   :  { %16 = sbr.rel (!%p14_p5) target bundleno = 2 (0x2), region = 85 }

</bundles_post_ra>
